<compile_context>
chip_gen: v7x
topology: tpu7x:2x2x1
jax: 0.10.0
libtpu: 0.0.40
codegen_flags: <defaults>
</compile_context>

<pallas_src>
import numpy as np
import jax
import jax.numpy as jnp
from jax.experimental import pallas as pl
from jax.experimental.pallas import tpu as pltpu

VMEM_LIMIT = 48 * 1024 * 1024  # <= v7x's 64 MiB physical VMEM, headroom for double-buffering


def _pad128(c):
    return ((c + 127) // 128) * 128


# ----------------------------------------------------------------------------
# gene parsing (mirrors the PyTorch helper)
# ----------------------------------------------------------------------------
def parse_gene(gene, stage_repeat):
    if gene is None:
        output_scale_ids = [-1] * (sum(stage_repeat) + 1)
        mid_scale_ids = [-1] * sum(stage_repeat)
    else:
        mid_scale_ids = gene[len(stage_repeat) + 1:len(stage_repeat) + 1 + sum(stage_repeat)]
        output_scale_ids = [gene[0]]
        for i in range(len(stage_repeat)):
            output_scale_ids += [gene[i + 1]] * stage_repeat[i]
    return output_scale_ids, mid_scale_ids


# ----------------------------------------------------------------------------
# Pallas kernels
# ----------------------------------------------------------------------------
def _make_matmul_kernel(relu_pre, has_add, relu_post):
    """out = [relu_post]( bn_affine( [relu_pre](x @ w) ) [+ add] ), f32 math inside."""
    if has_add:
        def kernel(x_ref, w_ref, s_ref, b_ref, a_ref, o_ref):
            acc = jnp.dot(x_ref[...], w_ref[...], preferred_element_type=jnp.float32)
            if relu_pre:
                acc = jnp.maximum(acc, 0.0)
            acc = acc * s_ref[...] + b_ref[...]
            acc = acc + a_ref[...].astype(jnp.float32)
            if relu_post:
                acc = jnp.maximum(acc, 0.0)
            o_ref[...] = acc.astype(o_ref.dtype)
    else:
        def kernel(x_ref, w_ref, s_ref, b_ref, o_ref):
            acc = jnp.dot(x_ref[...], w_ref[...], preferred_element_type=jnp.float32)
            if relu_pre:
                acc = jnp.maximum(acc, 0.0)
            acc = acc * s_ref[...] + b_ref[...]
            if relu_post:
                acc = jnp.maximum(acc, 0.0)
            o_ref[...] = acc.astype(o_ref.dtype)
    return kernel


def fused_matmul(x, w, scale, shift, add=None, relu_pre=False, relu_post=False,
                 out_dtype=jnp.bfloat16):
    """x:(M,K) bf16, w:(K,N) bf16, scale/shift:(N,) f32, add:(M,N) bf16 -> (M,N) out_dtype.

    N must be a multiple of 128 (guaranteed by channel padding), K is kept untiled.
    Grid tiles M and N; both axes are independent ("parallel").
    """
    M, K = x.shape
    N = w.shape[1]
    assert N % 128 == 0, N
    tn = 256 if N % 256 == 0 else 128
    tm = M if M <= 512 else 512
    grid = (pl.cdiv(M, tm), N // tn)

    kernel = _make_matmul_kernel(relu_pre, add is not None, relu_post)
    in_specs = [
        pl.BlockSpec((tm, K), lambda i, j: (i, 0)),
        pl.BlockSpec((K, tn), lambda i, j: (0, j)),
        pl.BlockSpec((1, tn), lambda i, j: (0, j)),
        pl.BlockSpec((1, tn), lambda i, j: (0, j)),
    ]
    args = [x, w, scale.reshape(1, N), shift.reshape(1, N)]
    if add is not None:
        in_specs.append(pl.BlockSpec((tm, tn), lambda i, j: (i, j)))
        args.append(add)

    return pl.pallas_call(
        kernel,
        out_shape=jax.ShapeDtypeStruct((M, N), out_dtype),
        grid=grid,
        in_specs=in_specs,
        out_specs=pl.BlockSpec((tm, tn), lambda i, j: (i, j)),
        compiler_params=pltpu.CompilerParams(
            dimension_semantics=("parallel", "parallel"),
            vmem_limit_bytes=VMEM_LIMIT,
        ),
    )(*args)


def _maxpool_reduce_kernel(x_ref, o_ref):
    # x: (9, tm, C) stacked window taps -> max over the 9 taps
    o_ref[...] = jnp.max(x_ref[...], axis=0)


def _avgpool_kernel(x_ref, o_ref):
    # x: (N, H*W, tc) -> mean over spatial (AdaptiveAvgPool2d((1,1))), f32 accumulation
    o_ref[...] = jnp.mean(x_ref[...].astype(jnp.float32), axis=1)


# ----------------------------------------------------------------------------
# glue: im2col / pooling wrappers (NHWC, bf16 activations)
# ----------------------------------------------------------------------------
def im2col(x, k, stride, pad):
    # TODO(synk): replace patch materialization with an in-kernel tap grid axis
    #             (accumulating jnp.dot per (dy,dx) shift) to avoid the k*k HBM inflation.
    N, H, W, C = x.shape
    Ho = (H + 2 * pad - k) // stride + 1
    Wo = (W + 2 * pad - k) // stride + 1
    xp = jnp.pad(x, ((0, 0), (pad, pad), (pad, pad), (0, 0)))
    cols = []
    for dy in range(k):
        for dx in range(k):
            cols.append(xp[:, dy:dy + stride * Ho:stride, dx:dx + stride * Wo:stride, :])
    patches = jnp.concatenate(cols, axis=-1)           # (N, Ho, Wo, k*k*C), bf16
    return patches.reshape(N * Ho * Wo, k * k * C), Ho, Wo


def maxpool_3x3_s2_p1(x):
    N, H, W, C = x.shape
    Ho = (H + 2 - 3) // 2 + 1
    Wo = (W + 2 - 3) // 2 + 1
    xp = jnp.pad(x, ((0, 0), (1, 1), (1, 1), (0, 0)), constant_values=float("-inf"))
    taps = [xp[:, dy:dy + 2 * Ho:2, dx:dx + 2 * Wo:2, :]
            for dy in range(3) for dx in range(3)]
    M = N * Ho * Wo
    stacked = jnp.stack(taps, axis=0).reshape(9, M, C)
    tm = M if M <= 1024 else 1024
    out = pl.pallas_call(
        _maxpool_reduce_kernel,
        out_shape=jax.ShapeDtypeStruct((M, C), x.dtype),
        grid=(pl.cdiv(M, tm),),
        in_specs=[pl.BlockSpec((9, tm, C), lambda i: (0, i, 0))],
        out_specs=pl.BlockSpec((tm, C), lambda i: (i, 0)),
        compiler_params=pltpu.CompilerParams(
            dimension_semantics=("parallel",),
            vmem_limit_bytes=VMEM_LIMIT,
        ),
    )(stacked)
    return out.reshape(N, Ho, Wo, C)


def global_avgpool(x):
    N, H, W, C = x.shape
    tc = 256 if C % 256 == 0 else 128
    xr = x.reshape(N, H * W, C)
    return pl.pallas_call(
        _avgpool_kernel,
        out_shape=jax.ShapeDtypeStruct((N, C), jnp.float32),
        grid=(C // tc,),
        in_specs=[pl.BlockSpec((N, H * W, tc), lambda j: (0, 0, j))],
        out_specs=pl.BlockSpec((N, tc), lambda j: (0, j)),
        compiler_params=pltpu.CompilerParams(
            dimension_semantics=("parallel",),
            vmem_limit_bytes=VMEM_LIMIT,
        ),
    )(xr)


# ----------------------------------------------------------------------------
# parameter construction (deterministic, mirrors ResNet_Prunednet.__init__)
# channels are zero-padded to multiples of 128; pad channels carry exact zeros.
# ----------------------------------------------------------------------------
def init_conv(key, cin, cout, k, cin_pad=None, cout_pad=None):
    cin_pad = cin if cin_pad is None else cin_pad
    cout_pad = cout if cout_pad is None else cout_pad
    w = jax.random.normal(key, (k * k, cin, cout), jnp.float32) / np.sqrt(k * k * cin)
    w_p = jnp.zeros((k * k, cin_pad, cout_pad), jnp.float32).at[:, :cin, :cout].set(w)
    # matmul layout: (k*k*cin_pad, cout_pad), row order (tap, cin) matching im2col
    return w_p.reshape(k * k * cin_pad, cout_pad).astype(jnp.bfloat16)


def init_bn(key, c, c_pad=None, eps=1e-5):
    c_pad = c if c_pad is None else c_pad
    k1, k2, k3, k4 = jax.random.split(key, 4)
    gamma = jax.random.uniform(k1, (c,), minval=0.5, maxval=1.5)
    beta = jax.random.normal(k2, (c,)) * 0.1
    mean = jax.random.normal(k3, (c,)) * 0.1
    var = jax.random.uniform(k4, (c,), minval=0.5, maxval=1.5)
    scale = gamma / jnp.sqrt(var + eps)
    shift = beta - mean * scale
    scale_p = jnp.zeros((c_pad,), jnp.float32).at[:c].set(scale)
    shift_p = jnp.zeros((c_pad,), jnp.float32).at[:c].set(shift)
    return scale_p, shift_p


def build_params(key, stage_repeat, num_classes, gene=None):
    channel_scales = [(10 + i * 3) / 100 for i in range(31)]
    stage_channels = [64, 256, 512, 1024, 2048]
    if gene is None:
        gene = [-1] * (len(stage_repeat) + 1 + sum(stage_repeat))
    output_scale_ids, mid_scale_ids = parse_gene(gene, stage_repeat)

    output_channels_o = [stage_channels[0]]
    for i in range(1, len(stage_channels)):
        output_channels_o += [stage_channels[i]] * stage_repeat[i - 1]
    mid_channels_o = []
    for i in range(1, len(stage_channels)):
        mid_channels_o += [int(stage_channels[i] / 4)] * stage_repeat[i - 1]

    output_channels = np.asarray(
        [output_channels_o[i] * channel_scales[output_scale_ids[i]]
         for i in range(len(output_scale_ids))], dtype=int).tolist()
    mid_channels = np.asarray(
        [mid_channels_o[i] * channel_scales[mid_scale_ids[i]]
         for i in range(len(mid_scale_ids))], dtype=int).tolist()

    keys = iter(jax.random.split(key, 8 * (1 + sum(stage_repeat)) + 8))
    params = {"num_classes": num_classes}

    oc0 = output_channels[0]
    oc0_p = _pad128(oc0)
    w0 = init_conv(next(keys), 3, oc0, 7, cin_pad=3, cout_pad=oc0_p)
    s0, b0 = init_bn(next(keys), oc0, oc0_p)
    params["first"] = {"w": w0, "scale": s0, "shift": b0}

    blocks = []
    block_num = 1
    for stage in range(len(stage_repeat)):
        for i in range(stage_repeat[stage]):
            stride = 2 if (stage != 0 and i == 0) else 1
            in_c = output_channels[block_num - 1]
            mid_c = mid_channels[block_num - 1]
            out_c = output_channels[block_num]
            in_p, mid_p, out_p = _pad128(in_c), _pad128(mid_c), _pad128(out_c)
            bp = {"stride": stride}
            bp["w1"] = init_conv(next(keys), in_c, mid_c, 1, in_p, mid_p)
            bp["s1"], bp["b1"] = init_bn(next(keys), mid_c, mid_p)
            bp["w2"] = init_conv(next(keys), mid_c, mid_c, 3, mid_p, mid_p)
            bp["s2"], bp["b2"] = init_bn(next(keys), mid_c, mid_p)
            bp["w3"] = init_conv(next(keys), mid_c, out_c, 1, mid_p, out_p)
            bp["s3"], bp["b3"] = init_bn(next(keys), out_c, out_p)
            if stride != 1 or in_c != out_c:
                bp["ws"] = init_conv(next(keys), in_c, out_c, 1, in_p, out_p)
                bp["s_sc"], bp["b_sc"] = init_bn(next(keys), out_c, out_p)
            blocks.append(bp)
            block_num += 1
    params["blocks"] = blocks

    # classifier: Linear(stage_channels[4], num_classes); logits padded to 128 lanes.
    c_last = output_channels[-1]
    c_last_p = _pad128(c_last)
    nc_p = _pad128(num_classes)
    kf1, kf2 = next(keys), next(keys)
    fc_w = jax.random.normal(kf1, (c_last, num_classes), jnp.float32) / np.sqrt(c_last)
    fc_w_p = jnp.zeros((c_last_p, nc_p), jnp.float32).at[:c_last, :num_classes].set(fc_w)
    fc_b = jax.random.normal(kf2, (num_classes,)) * 0.01
    fc_b_p = jnp.zeros((nc_p,), jnp.float32).at[:num_classes].set(fc_b)
    params["fc_w"] = fc_w_p.astype(jnp.bfloat16)
    params["fc_b"] = fc_b_p
    params["fc_s"] = jnp.ones((nc_p,), jnp.float32)
    return params


# ----------------------------------------------------------------------------
# forward pass
# ----------------------------------------------------------------------------
def first_conv_forward(x, p):
    N = x.shape[0]
    patches, Ho, Wo = im2col(x, k=7, stride=2, pad=3)
    y = fused_matmul(patches, p["w"], p["scale"], p["shift"], relu_pre=True)
    y = y.reshape(N, Ho, Wo, -1)
    return maxpool_3x3_s2_p1(y)


def bottleneck_forward(x, p):
    N, H, W, Cin = x.shape
    stride = p["stride"]

    # shortcut branch: conv1x1(stride) -> bn   (or identity)
    if "ws" in p:
        # TODO(synk): express the stride-2 subsampling via the BlockSpec index_map instead
        #             of a wrapper strided slice to avoid one extra HBM copy of x.
        xs = x[:, ::stride, ::stride, :] if stride != 1 else x
        Hs, Ws = xs.shape[1], xs.shape[2]
        sc = fused_matmul(xs.reshape(N * Hs * Ws, Cin), p["ws"], p["s_sc"], p["b_sc"])
    else:
        sc = x.reshape(N * H * W, Cin)

    # conv1 (1x1) -> relu -> bn1
    r = fused_matmul(x.reshape(N * H * W, Cin), p["w1"], p["s1"], p["b1"], relu_pre=True)
    r = r.reshape(N, H, W, -1)

    # conv2 (3x3, stride) -> relu -> bn2
    patches, Ho, Wo = im2col(r, k=3, stride=stride, pad=1)
    r = fused_matmul(patches, p["w2"], p["s2"], p["b2"], relu_pre=True)

    # conv3 (1x1) -> bn3 -> + shortcut -> relu   (fused in one kernel)
    out = fused_matmul(r, p["w3"], p["s3"], p["b3"], add=sc, relu_post=True)
    return out.reshape(N, Ho, Wo, -1)


def resnet_prunednet_forward(params, x_nchw):
    # accept NCHW like the PyTorch module, compute in NHWC / bf16
    x = jnp.transpose(x_nchw, (0, 2, 3, 1)).astype(jnp.bfloat16)
    x = first_conv_forward(x, params["first"])
    for bp in params["blocks"]:
        x = bottleneck_forward(x, bp)

    pooled = global_avgpool(x)                                   # (N, C) f32
    logits_p = fused_matmul(pooled.astype(jnp.bfloat16), params["fc_w"],
                            params["fc_s"], params["fc_b"], out_dtype=jnp.float32)
    return logits_p[:, :params["num_classes"]]


# ----------------------------------------------------------------------------
if __name__ == "__main__":
    # small but structurally faithful config: ResNet_Prunednet(stage_repeat=[1,1,1,1],
    # num_classes=10, gene=None) with 2x3x64x64 input (NCHW, like PyTorch)
    stage_repeat = [1, 1, 1, 1]
    num_classes = 10

    key = jax.random.PRNGKey(0)
    k_params, k_x = jax.random.split(key)
    params = build_params(k_params, stage_repeat, num_classes, gene=None)

    x = jax.random.normal(k_x, (2, 3, 64, 64), jnp.float32)

    logits = resnet_prunednet_forward(params, x)
    logits = jax.block_until_ready(logits)
    assert logits.shape == (2, num_classes), logits.shape
    assert bool(jnp.all(jnp.isfinite(logits)))
    print("KERNEL_OK")
</pallas_src>

<mosaic_0001>
module attributes {stable_mosaic.version = 11 : i64} {
  func.func @kernel(%arg0: i32, %arg1: i32, %arg2: memref<512x147xbf16, #tpu.memory_space<vmem>>, %arg3: memref<147x128xbf16, #tpu.memory_space<vmem>>, %arg4: memref<1x128xf32, #tpu.memory_space<vmem>>, %arg5: memref<1x128xf32, #tpu.memory_space<vmem>>, %arg6: memref<512x128xbf16, #tpu.memory_space<vmem>>) attributes {dimension_semantics = [#tpu.dimension_semantics<parallel>, #tpu.dimension_semantics<parallel>], iteration_bounds = array<i64: 4, 1>, scalar_prefetch = 0 : i64, scratch_operands = 0 : i64, tpu.core_type = #tpu.core_type<tc>, window_params = [{transform_indices = @transform_0, window_bounds = array<i64: 512, 147>}, {transform_indices = @transform_1, window_bounds = array<i64: 147, 128>}, {transform_indices = @transform_2, window_bounds = array<i64: 1, 128>}, {transform_indices = @transform_3, window_bounds = array<i64: 1, 128>}, {transform_indices = @transform_4, window_bounds = array<i64: 512, 128>}]} {
    %c0 = arith.constant 0 : index
    %c0_0 = arith.constant 0 : index
    %0 = vector.load %arg2[%c0, %c0_0] : memref<512x147xbf16, #tpu.memory_space<vmem>>, vector<512x147xbf16>
    %c0_1 = arith.constant 0 : index
    %c0_2 = arith.constant 0 : index
    %1 = vector.load %arg3[%c0_1, %c0_2] : memref<147x128xbf16, #tpu.memory_space<vmem>>, vector<147x128xbf16>
    %cst = arith.constant dense<0.000000e+00> : vector<512x128xf32>
    %2 = tpu.matmul %0, %1, %cst {dimension_numbers = #tpu.dot_dimension_numbers<[1], [0], [0], [1], [0, 0, 1, 1], [], []>} : vector<512x147xbf16>, vector<147x128xbf16>, vector<512x128xf32> -> vector<512x128xf32>
    %cst_3 = arith.constant 0.000000e+00 : f32
    %3 = vector.broadcast %cst_3 : f32 to vector<512x128xf32>
    %4 = arith.maximumf %2, %3 : vector<512x128xf32>
    %c0_4 = arith.constant 0 : index
    %c0_5 = arith.constant 0 : index
    %5 = vector.load %arg4[%c0_4, %c0_5] : memref<1x128xf32, #tpu.memory_space<vmem>>, vector<1x128xf32>
    %6 = vector.broadcast %5 : vector<1x128xf32> to vector<512x128xf32>
    %7 = arith.mulf %4, %6 : vector<512x128xf32>
    %c0_6 = arith.constant 0 : index
    %c0_7 = arith.constant 0 : index
    %8 = vector.load %arg5[%c0_6, %c0_7] : memref<1x128xf32, #tpu.memory_space<vmem>>, vector<1x128xf32>
    %9 = vector.broadcast %8 : vector<1x128xf32> to vector<512x128xf32>
    %10 = arith.addf %7, %9 : vector<512x128xf32>
    %11 = arith.truncf %10 : vector<512x128xf32> to vector<512x128xbf16>
    %c0_8 = arith.constant 0 : index
    %c0_9 = arith.constant 0 : index
    %12 = vector.load %arg6[%c0_8, %c0_9] : memref<512x128xbf16, #tpu.memory_space<vmem>>, vector<512x128xbf16>
    tpu.vector_store %arg6[%c0_8, %c0_9], %11 {strides = array<i32>} : memref<512x128xbf16, #tpu.memory_space<vmem>>, vector<512x128xbf16>,
    return
  }
  func.func @transform_0(%arg0: i32, %arg1: i32) -> (i32, i32) {
    %c0_i32 = arith.constant 0 : i32
    %c0_i32_0 = arith.constant 0 : i32
    return %arg0, %c0_i32 : i32, i32
  }
  func.func @transform_1(%arg0: i32, %arg1: i32) -> (i32, i32) {
    %c0_i32 = arith.constant 0 : i32
    %c0_i32_0 = arith.constant 0 : i32
    return %c0_i32, %arg1 : i32, i32
  }
  func.func @transform_2(%arg0: i32, %arg1: i32) -> (i32, i32) {
    %c0_i32 = arith.constant 0 : i32
    %c0_i32_0 = arith.constant 0 : i32
    return %c0_i32, %arg1 : i32, i32
  }
  func.func @transform_3(%arg0: i32, %arg1: i32) -> (i32, i32) {
    %c0_i32 = arith.constant 0 : i32
    %c0_i32_0 = arith.constant 0 : i32
    return %c0_i32, %arg1 : i32, i32
  }
  func.func @transform_4(%arg0: i32, %arg1: i32) -> (i32, i32) {
    %c0_i32 = arith.constant 0 : i32
    return %arg0, %arg1 : i32, i32
  }
}

</mosaic_0001>

<bundles_post_ra>
// kernel: tpu_custom_call.1
= control target key start
LH: loop header
LB: loop body
LE: loop exit
PB: predicated region body
PF: predicated region fallthrough
CT: control target
= control target key end

     0   :  { %9 = vsyncpa [#allocation3], 0  ;;  %s2895_s0 = inlined_call_operand.vmem [shape: bf16[2048,147], index: 0, kind: input, shape index: {}]   ;;  %s2896_s1 = inlined_call_operand.vmem [shape: bf16[147,128], index: 1, kind: input, shape index: {}]   ;;  %s2897_s2 = inlined_call_operand.vmem [shape: f32[1,128], index: 2, kind: input, shape index: {}]   ;;  %s2898_s3 = inlined_call_operand.vmem [shape: f32[1,128], index: 3, kind: input, shape index: {}]   ;;  %s2899_s4 = inlined_call_operand.hbm [shape: bf16[2048,128], index: 4, kind: output, shape index: {}]  }
   0x1   :  { %11 = vsyncpa [#allocation3 + $0x1], 0  ;;  %s2476_s15 = smov 0   ;;  %s2478_s16 = smov 0  }
   0x2   :  { %s2480_s17 = smov 0   ;;  %s2482_s18 = smov 0  }
   0x3   :  { %s2484_s19 = smov 0   ;;  %s2486_s20 = smov 0  }
   0x4 LB: > { %s1735_s21 = sadd.s32 4294967295, %s2444_s20   ;;  %s1736_s22 = sadd.s32 4294967294, %s2444_s20   ;;  %s2444_s20 = sphi %s2486_s20, %s17_s20   ;;  %s2440_s19 = sphi %s2484_s19, %s2906_s19   ;;  %s2436_s18 = sphi %s2482_s18, %s2905_s18   ;;  %s2432_s17 = sphi %s2480_s17, %s2904_s17   ;;  %s2428_s16 = sphi %s2478_s16, %s2903_s16   ;;  %s2424_s15 = sphi %s2476_s15, %s2902_s15  }
   0x5   : > { %s29_s23 = sadd.s32 1, %s2440_s19  ;;  %s142_s24 = sadd.s32 1, %s2432_s17 }
   0x6   : > { %p31_p0 = scmp.ge.s32.totalorder %s29_s23, 4  ;;  %p152_p1 = scmp.ne.s32.totalorder %s2432_s17, %s2428_s16 }
   0x7   : > { %p153_p2 = scmp.eq.s32.totalorder %s1735_s21, 3  ;;  %p158_p3 = scmp.ne.s32.totalorder %s2428_s16, %s2424_s15 }
   0x8   : > { %s2908_s23 = smov (%p31_p0, %s29_s23), 0  ;;  %p159_p5 = scmp.eq.s32.totalorder %s1736_s22, 3 }
   0x9   : > { %p2516_p4 = por %p153_p2, %p152_p1  ;;  %s137_s26 = ssub.s32 %s2440_s19, %s2908_s23 }
   0xa   : > { %p1742_p6 = scmp.ge.s32.totalorder %s2444_s20, 1  ;;  %p140_p7 = scmp.eq.s32.totalorder %s137_s26, 0 }
   0xb   : > { %p2523_p8 = por %p159_p5, %p158_p3  ;;  %p206_p9 = scmp.lt.s32.totalorder %s2444_s20, 5 }
   0xc   : > { %s2529_s28 = scalar_select %p140_p7, %s2432_s17, %s142_s24  }
   0xd   : > { %p207_p10 = pnand %p1742_p6, %p206_p9 }
   0xe   : > { %v2260_v0 = vld [vmem:[%s2896_s1] sm:$0xff] (!%p207_p10)   ;;  %v2446_v1 = vmov (!%p207_p10), 0   ;;  %v2261_v2 = vld [vmem:[%s2896_s1 + $0x8] sm:$0xff] (!%p207_p10)   ;;  %v2262_v3 = vld [vmem:[%s2896_s1 + $0x10] sm:$0xff] (!%p207_p10)   ;;  %s1744_s9 = sshll.u32 (!%p207_p10), %s2436_s18, 6  ;;  %vm690_vm0 = vcmask (!%p207_p10), 154624  }
   0xf   : > { %210 = sbr.rel (%p207_p10) target bundleno = 412 (0x19c), region = 36  ;;  %794 = vmatprep.subr.bf16.mxu0 (!%p207_p10), %v2446_v1  ;;  %2181 = vmatprep.subr.bf16.mxu1 (!%p207_p10), %v2446_v1  ;;  %p244_p11 = scmp.lt.s32.totalorder (!%p207_p10), %s1744_s9, 255  ;;  %v2263_v4 = vld [vmem:[%s2896_s1 + $0x18] sm:$0xff] (!%p207_p10)   ;;  %v2264_v5 = vld [vmem:[%s2896_s1 + $0x20] sm:$0xff] (!%p207_p10)   ;;  %v2265_v8 = vld [vmem:[%s2896_s1 + $0x28] sm:$0xff] (!%p207_p10)   ;;  %vm787_vm1 = vcmask (!%p207_p10), 1040384  }
  0x10   : > { %795 = vmatpush1.bf16.msra.mxu0 (!%p207_p10), %v2260_v0  ;;  %2191 = vmatpush1.bf16.msra.mxu1 (!%p207_p10), %v2260_v0  ;;  %v2266_v9 = vld [vmem:[%s2896_s1 + $0x30] sm:$0xff] (!%p207_p10)   ;;  %v2267_v10 = vld [vmem:[%s2896_s1 + $0x38] sm:$0xff] (!%p207_p10)   ;;  %vm788_vm2 = vcmask (!%p207_p10), 1041408   ;;  %v2447_v11 = vmov (!%p207_p10), 65535   ;;  %v2268_v13 = vld [vmem:[%s2896_s1 + $0x40] sm:$0xff] (!%p207_p10)   ;;  %s240_s14 = sand.u32 (!%p207_p10), 1, %s2428_s16  }
  0x11   : > { %796 = vmatprep.subr.bf16.mxu0 (!%p207_p10), %v2446_v1  ;;  %2182 = vmatprep.subr.bf16.mxu1 (!%p207_p10), %v2446_v1  ;;  %v789_v12 = vsel (!%p207_p10), %vm787_vm1, 4294967295, %v2447_v11  ;;  %v2269_v14 = vld [vmem:[%s2896_s1 + $0x48] ss:$0 sps:$4 sm:$0x33] (!%p207_p10)   ;;  %s1743_s24 = sshll.u32 (!%p207_p10), %s240_s14, 8  ;;  %s1989_s29 = sshll.u32 (!%p207_p10), %s2436_s18, 12 }
  0x12   : > { %v790_v15 = vsel (!%p207_p10), %vm788_vm2, %v789_v12, 0  ;;  %s2684_s26 = scalar_lea.vmem (!%p207_p10), [#allocation2], %s1743_s24  ;;  %s2841_s7 = scalar_lea.hbm (!%p207_p10), %s2899_s4, %s1989_s29 }
  0x13   : > { %v792_v16 = vand.u32 (!%p207_p10), %v2269_v14, %v790_v15  ;;  %s1624_s30 = sshll.u32 (!%p207_p10), %s2684_s26, 4  ;;  %s2849_s18 = scalar_lea.sflag (!%p207_p10), [#allocation3], %s240_s14  ;;  %s2843_s30 = int_to_ptr.vmem [resolvable:$true] %s1624_s30 }
  0x14   : > { %797 = vmatpush1.bf16.msra.mxu0 (!%p207_p10), %v2261_v2  ;;  %2192 = vmatpush1.bf16.msra.mxu1 (!%p207_p10), %v2261_v2  ;;  %s2366_s8 = scalar_lea.vmem (!%p207_p10), %s2843_s30, 4096 }
  0x15   : > { %798 = vmatprep.subr.bf16.mxu0 (!%p207_p10), %v2446_v1  ;;  %2183 = vmatprep.subr.bf16.mxu1 (!%p207_p10), %v2446_v1  ;;  %p2367_p12 = scmp.ne.s32.totalorder (!%p207_p10), %s2843_s30, %s2366_s8 }
  0x16   : > { %s2910_s9 = smov (!%p244_p11, %s1744_s9), 255 }
  0x17   : > { %s1924_s12 = sshll.u32 %s2910_s9, 3  ;;  %p2368_p13 = pnand %p2367_p12, %p2516_p4 }
  0x18   : > { %799 = vmatpush1.bf16.msra.mxu0 %v2262_v3  ;;  %2193 = vmatpush1.bf16.msra.mxu1 %v2262_v3  ;;  %s2547_s21 = scalar_lea.vmem %s2895_s0, %s1924_s12  ;;  %s2448_s9 = smov [#allocation2]  }
  0x19   : > { %800 = vmatprep.subr.bf16.mxu0 %v2446_v1  ;;  %2184 = vmatprep.subr.bf16.mxu1 %v2446_v1  ;;  %v2272_v6 = vld [vmem:[%s2547_s21 + $0x4] ss:$8 sps:$4 sm:$0xff]   ;;  %v2270_v17 = vld [vmem:[%s2547_s21] ss:$8 sps:$4 sm:$0xff]   ;;  %v2276_v19 = vld [vmem:[%s2547_s21 + $0x14] ss:$8 sps:$4 sm:$0xff]   ;;  %p2369_p0 = pneg %p2368_p13 }
  0x1a   : > { %v2275_v7 = vld [vmem:[%s2547_s21 + $0x104] ss:$8 sps:$4 sm:$0xff]   ;;  %1821 = vmatprep.mubr.msk.bf16.mxu0 %vm690_vm0, %v2272_v6  ;;  %v2273_v18 = vld [vmem:[%s2547_s21 + $0x100] ss:$8 sps:$4 sm:$0xff]   ;;  %v2278_v20 = vld [vmem:[%s2547_s21 + $0x114] ss:$8 sps:$4 sm:$0xff]  }
  0x1b   : > { %1837 = vmatprep.mubr.msk.bf16.mxu1 %vm690_vm0, %v2275_v7  ;;  %v2280_v21 = vld [vmem:[%s2547_s21 + $0x10] ss:$8 sps:$4 sm:$0xff]   ;;  %v2282_v23 = vld [vmem:[%s2547_s21 + $0x24] ss:$8 sps:$4 sm:$0xff]   ;;  %v2286_v25 = vld [vmem:[%s2547_s21 + $0x20] ss:$8 sps:$4 sm:$0xff]  }
  0x1c   : > { %801 = vmatpush1.bf16.msra.mxu0 %v2263_v4  ;;  %2194 = vmatpush1.bf16.msra.mxu1 %v2263_v4  ;;  %v2281_v22 = vld [vmem:[%s2547_s21 + $0x110] ss:$8 sps:$4 sm:$0xff]   ;;  %v2284_v24 = vld [vmem:[%s2547_s21 + $0x124] ss:$8 sps:$4 sm:$0xff]   ;;  %v2287_v26 = vld [vmem:[%s2547_s21 + $0x120] ss:$8 sps:$4 sm:$0xff]  }
  0x1d   : > { %802 = vmatprep.subr.bf16.mxu0 %v2446_v1  ;;  %2185 = vmatprep.subr.bf16.mxu1 %v2446_v1  ;;  %v2288_v27 = vld [vmem:[%s2547_s21 + $0x34] ss:$8 sps:$4 sm:$0xff]   ;;  %v2292_v29 = vld [vmem:[%s2547_s21 + $0x30] ss:$8 sps:$4 sm:$0xff]   ;;  %v2294_v31 = vld [vmem:[%s2547_s21 + $0x44] ss:$8 sps:$4 sm:$0xff]  }
  0x1e   : > { %v2290_v28 = vld [vmem:[%s2547_s21 + $0x134] ss:$8 sps:$4 sm:$0xff]   ;;  %v2293_v30 = vld [vmem:[%s2547_s21 + $0x130] ss:$8 sps:$4 sm:$0xff]   ;;  %v2296_v32 = vld [vmem:[%s2547_s21 + $0x144] ss:$8 sps:$4 sm:$0xff]  }
  0x1f   : > { %v2298_v33 = vld [vmem:[%s2547_s21 + $0x40] ss:$8 sps:$4 sm:$0xff]   ;;  %v2300_v35 = vld [vmem:[%s2547_s21 + $0x54] ss:$8 sps:$4 sm:$0xff]   ;;  %v2304_v37 = vld [vmem:[%s2547_s21 + $0x50] ss:$8 sps:$4 sm:$0xff]  }
  0x20   : > { %803 = vmatpush1.bf16.msra.mxu0 %v2264_v5  ;;  %2195 = vmatpush1.bf16.msra.mxu1 %v2264_v5  ;;  %v2299_v34 = vld [vmem:[%s2547_s21 + $0x140] ss:$8 sps:$4 sm:$0xff]   ;;  %v2302_v36 = vld [vmem:[%s2547_s21 + $0x154] ss:$8 sps:$4 sm:$0xff]   ;;  %v2305_v38 = vld [vmem:[%s2547_s21 + $0x150] ss:$8 sps:$4 sm:$0xff]  }
  0x21   : > { %804 = vmatprep.subr.bf16.mxu0 %v2446_v1  ;;  %2186 = vmatprep.subr.bf16.mxu1 %v2446_v1  ;;  %v2306_v39 = vld [vmem:[%s2547_s21 + $0x64] ss:$8 sps:$4 sm:$0xff]   ;;  %v2310_v41 = vld [vmem:[%s2547_s21 + $0x60] ss:$8 sps:$4 sm:$0xff]   ;;  %v2312_v43 = vld [vmem:[%s2547_s21 + $0x74] ss:$8 sps:$4 sm:$0xff]  }
  0x22   : > { %v2308_v40 = vld [vmem:[%s2547_s21 + $0x164] ss:$8 sps:$4 sm:$0xff]   ;;  %v2311_v42 = vld [vmem:[%s2547_s21 + $0x160] ss:$8 sps:$4 sm:$0xff]   ;;  %v2314_v44 = vld [vmem:[%s2547_s21 + $0x174] ss:$8 sps:$4 sm:$0xff]  }
  0x23   : > { %v2316_v45 = vld [vmem:[%s2547_s21 + $0x70] ss:$8 sps:$4 sm:$0xff]   ;;  %v2318_v47 = vld [vmem:[%s2547_s21 + $0x84] ss:$8 sps:$4 sm:$0xff]   ;;  %v2322_v49 = vld [vmem:[%s2547_s21 + $0x80] ss:$8 sps:$4 sm:$0xff]  }
  0x24   : > { %805 = vmatpush1.bf16.msra.mxu0 %v2265_v8  ;;  %2196 = vmatpush1.bf16.msra.mxu1 %v2265_v8  ;;  %v2317_v46 = vld [vmem:[%s2547_s21 + $0x170] ss:$8 sps:$4 sm:$0xff]   ;;  %v2320_v48 = vld [vmem:[%s2547_s21 + $0x184] ss:$8 sps:$4 sm:$0xff]   ;;  %v2323_v50 = vld [vmem:[%s2547_s21 + $0x180] ss:$8 sps:$4 sm:$0xff]  }
  0x25   : > { %806 = vmatprep.subr.bf16.mxu0 %v2446_v1  ;;  %2187 = vmatprep.subr.bf16.mxu1 %v2446_v1  ;;  %v2324_v51 = vld [vmem:[%s2547_s21 + $0x94] ss:$8 sps:$4 sm:$0xff]   ;;  %v2328_v53 = vld [vmem:[%s2547_s21 + $0x90] ss:$8 sps:$4 sm:$0xff]   ;;  %v2330_v55 = vld [vmem:[%s2547_s21 + $0xa4] ss:$8 sps:$4 sm:$0xff]  }
  0x26   : > { %v2326_v52 = vld [vmem:[%s2547_s21 + $0x194] ss:$8 sps:$4 sm:$0xff]   ;;  %v2329_v54 = vld [vmem:[%s2547_s21 + $0x190] ss:$8 sps:$4 sm:$0xff]   ;;  %v2332_v56 = vld [vmem:[%s2547_s21 + $0x1a4] ss:$8 sps:$4 sm:$0xff]  }
  0x27   : > { %v2334_v57 = vld [vmem:[%s2547_s21 + $0xa0] ss:$8 sps:$4 sm:$0xff]   ;;  %v2336_v59 = vld [vmem:[%s2547_s21 + $0xb4] ss:$8 sps:$4 sm:$0xff]   ;;  %v2340_v61 = vld [vmem:[%s2547_s21 + $0xb0] ss:$8 sps:$4 sm:$0xff]  }
  0x28   : > { %807 = vmatpush1.bf16.msra.mxu0 %v2266_v9  ;;  %2197 = vmatpush1.bf16.msra.mxu1 %v2266_v9  ;;  %v2335_v58 = vld [vmem:[%s2547_s21 + $0x1a0] ss:$8 sps:$4 sm:$0xff]   ;;  %v2338_v60 = vld [vmem:[%s2547_s21 + $0x1b4] ss:$8 sps:$4 sm:$0xff]   ;;  %v2341_v62 = vld [vmem:[%s2547_s21 + $0x1b0] ss:$8 sps:$4 sm:$0xff]  }
  0x29   : > { %808 = vmatprep.subr.bf16.mxu0 %v2446_v1  ;;  %2188 = vmatprep.subr.bf16.mxu1 %v2446_v1  ;;  %v2342_v63 = vld [vmem:[%s2547_s21 + $0xc4] ss:$8 sps:$4 sm:$0xff]   ;;  %v2347_v2 = vld [vmem:[%s2547_s21 + $0x1c0] ss:$8 sps:$4 sm:$0xff]   ;;  %v2348_v3 = vld [vmem:[%s2547_s21 + $0xd4] ss:$8 sps:$4 sm:$0xff]  }
  0x2a   : > { %v2344_v0 = vld [vmem:[%s2547_s21 + $0x1c4] ss:$8 sps:$4 sm:$0xff]   ;;  %v2350_v4 = vld [vmem:[%s2547_s21 + $0x1d4] ss:$8 sps:$4 sm:$0xff]   ;;  %v2352_v5 = vld [vmem:[%s2547_s21 + $0xd0] ss:$8 sps:$4 sm:$0xff]  }
  0x2b   : > { %v2353_v6 = vld [vmem:[%s2547_s21 + $0x1d0] ss:$8 sps:$4 sm:$0xff]   ;;  %v2354_v7 = vld [vmem:[%s2547_s21 + $0xe4] ss:$8 sps:$4 sm:$0xff]   ;;  %v2358_v9 = vld [vmem:[%s2547_s21 + $0xe0] ss:$8 sps:$4 sm:$0xff]  }
  0x2c   : > { %809 = vmatpush1.bf16.msra.mxu0 %v2267_v10  ;;  %2198 = vmatpush1.bf16.msra.mxu1 %v2267_v10  ;;  %v2356_v8 = vld [vmem:[%s2547_s21 + $0x1e4] ss:$8 sps:$4 sm:$0xff]   ;;  %v2359_v10 = vld [vmem:[%s2547_s21 + $0x1e0] ss:$8 sps:$4 sm:$0xff]   ;;  %v2360_v11 = vld [vmem:[%s2547_s21 + $0xf4] ss:$8 sps:$4 sm:$0xff]  }
  0x2d   : > { %810 = vmatprep.subr.bf16.mxu0 %v2446_v1  ;;  %2189 = vmatprep.subr.bf16.mxu1 %v2446_v1  ;;  %v2362_v12 = vld [vmem:[%s2547_s21 + $0x1f4] ss:$8 sps:$4 sm:$0xff]   ;;  %v2365_v14 = vld [vmem:[%s2547_s21 + $0x1f0] ss:$8 sps:$4 sm:$0xff]   ;;  %s2370_s10 = sshll.u32 %s2448_s9, 4  ;;  %s2371_s10 = int_to_ptr.vmem [resolvable:$false] %s2370_s10 }
  0x2e   : > { %s2372_s11 = scalar_lea.vmem %s2371_s10, 8192  ;;  %p2373_p1 = scmp.lt.s32.totalorder %s2843_s30, %s2371_s10 }
  0x2f   : > { %p2374_p2 = scmp.lt.s32.totalorder %s2372_s11, %s2366_s8 }
  0x30   : > { %811 = vmatpush1.bf16.msra.mxu0 %v2268_v13  ;;  %2199 = vmatpush1.bf16.msra.mxu1 %v2268_v13  ;;  %v2364_v13 = vld [vmem:[%s2547_s21 + $0xf0] ss:$8 sps:$4 sm:$0xff]  }
  0x31   : > { %812 = vmatprep.subr.bf16.mxu0 %v2446_v1  ;;  %2190 = vmatprep.subr.bf16.mxu1 %v2446_v1  ;;  %v2346_v1 = vld [vmem:[%s2547_s21 + $0xc0] ss:$8 sps:$4 sm:$0xff]   ;;  %p2375_p3 = por %p2374_p2, %p2373_p1 }
  0x33   : > { %p2376_p5 = pnand %p2375_p3, %p2369_p0 }
  0x34   : > { %813 = vmatpush1.bf16.msra.mxu0 %v792_v16  ;;  %2200 = vmatpush1.bf16.msra.mxu1 %v792_v16  ;;  %v2666_v16 = vld [vmem:[%s2897_s2] ss:$0 sm:$0xff] }
  0x37   : > { %827 = vmatmul.mubr.bf16.vlgmr.msra.gmra.mrb[0].mxu0 %v2270_v17  ;;  %955 = vmatmul.mubr.bf16.vlgmr.msra.gmra.mrb[0].mxu1 %v2273_v18 }
  0x38   : > { %1822 = vmatprep.mubr.msk.bf16.mxu0 %vm690_vm0, %v2276_v19  ;;  %1838 = vmatprep.mubr.msk.bf16.mxu1 %vm690_vm0, %v2278_v20 }
  0x3f   : > { %835 = vmatmul.mubr.bf16.gmra.mrb[4].mxu0 %v2280_v21  ;;  %963 = vmatmul.mubr.bf16.gmra.mrb[4].mxu1 %v2281_v22 }
  0x40   : > { %1823 = vmatprep.mubr.msk.bf16.mxu0 %vm690_vm0, %v2282_v23  ;;  %1839 = vmatprep.mubr.msk.bf16.mxu1 %vm690_vm0, %v2284_v24 }
  0x47   : > { %843 = vmatmul.mubr.bf16.gmra.mrb[8].mxu0 %v2286_v25  ;;  %971 = vmatmul.mubr.bf16.gmra.mrb[8].mxu1 %v2287_v26 }
  0x48   : > { %1824 = vmatprep.mubr.msk.bf16.mxu0 %vm690_vm0, %v2288_v27  ;;  %1840 = vmatprep.mubr.msk.bf16.mxu1 %vm690_vm0, %v2290_v28 }
  0x4f   : > { %851 = vmatmul.mubr.bf16.gmra.mrb[12].mxu0 %v2292_v29  ;;  %979 = vmatmul.mubr.bf16.gmra.mrb[12].mxu1 %v2293_v30  ;;  %v2674_v30 = vld [vmem:[%s2898_s3] ss:$0 sm:$0xff] }
  0x50   : > { %1825 = vmatprep.mubr.msk.bf16.mxu0 %vm690_vm0, %v2294_v31  ;;  %1841 = vmatprep.mubr.msk.bf16.mxu1 %vm690_vm0, %v2296_v32 }
  0x57   : > { %859 = vmatmul.mubr.bf16.gmra.mrb[16].mxu0 %v2298_v33  ;;  %987 = vmatmul.mubr.bf16.gmra.mrb[16].mxu1 %v2299_v34 }
  0x58   : > { %1826 = vmatprep.mubr.msk.bf16.mxu0 %vm690_vm0, %v2300_v35  ;;  %1842 = vmatprep.mubr.msk.bf16.mxu1 %vm690_vm0, %v2302_v36 }
  0x5f   : > { %867 = vmatmul.mubr.bf16.gmra.mrb[20].mxu0 %v2304_v37  ;;  %995 = vmatmul.mubr.bf16.gmra.mrb[20].mxu1 %v2305_v38 }
  0x60   : > { %1827 = vmatprep.mubr.msk.bf16.mxu0 %vm690_vm0, %v2306_v39  ;;  %1843 = vmatprep.mubr.msk.bf16.mxu1 %vm690_vm0, %v2308_v40 }
  0x67   : > { %875 = vmatmul.mubr.bf16.gmra.mrb[24].mxu0 %v2310_v41  ;;  %1003 = vmatmul.mubr.bf16.gmra.mrb[24].mxu1 %v2311_v42 }
  0x68   : > { %1828 = vmatprep.mubr.msk.bf16.mxu0 %vm690_vm0, %v2312_v43  ;;  %1844 = vmatprep.mubr.msk.bf16.mxu1 %vm690_vm0, %v2314_v44 }
  0x6f   : > { %883 = vmatmul.mubr.bf16.gmra.mrb[28].mxu0 %v2316_v45  ;;  %1011 = vmatmul.mubr.bf16.gmra.mrb[28].mxu1 %v2317_v46 }
  0x70   : > { %1829 = vmatprep.mubr.msk.bf16.mxu0 %vm690_vm0, %v2318_v47  ;;  %1845 = vmatprep.mubr.msk.bf16.mxu1 %vm690_vm0, %v2320_v48 }
  0x77   : > { %891 = vmatmul.mubr.bf16.gmra.mrb[32].mxu0 %v2322_v49  ;;  %1019 = vmatmul.mubr.bf16.gmra.mrb[32].mxu1 %v2323_v50 }
  0x78   : > { %1830 = vmatprep.mubr.msk.bf16.mxu0 %vm690_vm0, %v2324_v51  ;;  %1846 = vmatprep.mubr.msk.bf16.mxu1 %vm690_vm0, %v2326_v52 }
  0x7f   : > { %899 = vmatmul.mubr.bf16.gmra.mrb[36].mxu0 %v2328_v53  ;;  %1027 = vmatmul.mubr.bf16.gmra.mrb[36].mxu1 %v2329_v54 }
  0x80   : > { %1831 = vmatprep.mubr.msk.bf16.mxu0 %vm690_vm0, %v2330_v55  ;;  %1847 = vmatprep.mubr.msk.bf16.mxu1 %vm690_vm0, %v2332_v56 }
  0x87   : > { %907 = vmatmul.mubr.bf16.gmra.mrb[40].mxu0 %v2334_v57  ;;  %1035 = vmatmul.mubr.bf16.gmra.mrb[40].mxu1 %v2335_v58 }
  0x88   : > { %1832 = vmatprep.mubr.msk.bf16.mxu0 %vm690_vm0, %v2336_v59  ;;  %1848 = vmatprep.mubr.msk.bf16.mxu1 %vm690_vm0, %v2338_v60 }
  0x8f   : > { %915 = vmatmul.mubr.bf16.gmra.mrb[44].mxu0 %v2340_v61  ;;  %1043 = vmatmul.mubr.bf16.gmra.mrb[44].mxu1 %v2341_v62 }
  0x90   : > { %1833 = vmatprep.mubr.msk.bf16.mxu0 %vm690_vm0, %v2342_v63  ;;  %1849 = vmatprep.mubr.msk.bf16.mxu1 %vm690_vm0, %v2344_v0 }
  0x97   : > { %923 = vmatmul.mubr.bf16.gmra.mrb[48].mxu0 %v2346_v1  ;;  %1051 = vmatmul.mubr.bf16.gmra.mrb[48].mxu1 %v2347_v2 }
  0x98   : > { %1834 = vmatprep.mubr.msk.bf16.mxu0 %vm690_vm0, %v2348_v3  ;;  %1850 = vmatprep.mubr.msk.bf16.mxu1 %vm690_vm0, %v2350_v4 }
  0x9f   : > { %931 = vmatmul.mubr.bf16.gmra.mrb[52].mxu0 %v2352_v5  ;;  %1059 = vmatmul.mubr.bf16.gmra.mrb[52].mxu1 %v2353_v6 }
  0xa0   : > { %1835 = vmatprep.mubr.msk.bf16.mxu0 %vm690_vm0, %v2354_v7  ;;  %1851 = vmatprep.mubr.msk.bf16.mxu1 %vm690_vm0, %v2356_v8 }
  0xa7   : > { %939 = vmatmul.mubr.bf16.gmra.mrb[56].mxu0 %v2358_v9  ;;  %1067 = vmatmul.mubr.bf16.gmra.mrb[56].mxu1 %v2359_v10 }
  0xa8   : > { %1836 = vmatprep.mubr.msk.bf16.mxu0 %vm690_vm0, %v2360_v11  ;;  %1852 = vmatprep.mubr.msk.bf16.mxu1 %vm690_vm0, %v2362_v12 }
  0xaf   : > { %947 = vmatmul.mubr.bf16.gmra.mrb[60].mxu0 %v2364_v13  ;;  %1075 = vmatmul.mubr.bf16.gmra.mrb[60].mxu1 %v2365_v14 }
 0x10a   : > { %v828_v15 = vpop.f32.mrb[0].mxu0  ;;  %v956_v17 = vpop.f32.mrb[0].mxu1 }
 0x10b   : > { %v1083_v18 = vmax.f32 %v828_v15, 0.0  ;;  %v1115_v19 = vmax.f32 %v956_v17, 0.0  ;;  %v830_v20 = vpop.f32.mrb[1].mxu0  ;;  %v958_v21 = vpop.f32.mrb[1].mxu1 }
 0x10c   : > { %v831_v22 = vpop.f32.mrb[2].mxu0  ;;  %v959_v23 = vpop.f32.mrb[2].mxu1 }
 0x10d   : > { %v1154_v24 = vmul.f32 %v2666_v16, %v1083_v18  ;;  %v1186_v25 = vmul.f32 %v2666_v16, %v1115_v19  ;;  %v1084_v26 = vmax.f32 %v831_v22, 0.0  ;;  %v1116_v27 = vmax.f32 %v959_v23, 0.0  ;;  %v833_v28 = vpop.f32.mrb[3].mxu0  ;;  %v961_v29 = vpop.f32.mrb[3].mxu1 }
 0x10f   : > { %v1155_v31 = vmul.f32 %v2666_v16, %v1084_v26  ;;  %v1187_v32 = vmul.f32 %v2666_v16, %v1116_v27  ;;  %v1225_v33 = vadd.f32 %v2674_v30, %v1154_v24  ;;  %v1257_v34 = vadd.f32 %v2674_v30, %v1186_v25 }
 0x111   : > { %v1226_v35 = vadd.f32 %v2674_v30, %v1155_v31  ;;  %v1258_v36 = vadd.f32 %v2674_v30, %v1187_v32 }
 0x112   : > { %v836_v37 = vpop.f32.mrb[4].mxu0  ;;  %v964_v38 = vpop.f32.mrb[4].mxu1 }
 0x113   : > { %v1993_v39 = vpack.c.bf16 %v1226_v35, %v1225_v33  ;;  %v2073_v40 = vpack.c.bf16 %v1258_v36, %v1257_v34  ;;  %v1085_v41 = vmax.f32 %v836_v37, 0.0  ;;  %v1117_v42 = vmax.f32 %v964_v38, 0.0  ;;  %v838_v43 = vpop.f32.mrb[5].mxu0  ;;  %v966_v44 = vpop.f32.mrb[5].mxu1 }
 0x114   : > { %v839_v45 = vpop.f32.mrb[6].mxu0  ;;  %v967_v46 = vpop.f32.mrb[6].mxu1 }
 0x115   : > { %1994 = vst [vmem:[%s2684_s26] sm:$0xff] %v1993_v39   ;;  %2165 = vst [vmem:[%s2684_s26 + $0x80] sm:$0xff] %v2073_v40   ;;  %v1156_v47 = vmul.f32 %v2666_v16, %v1085_v41  ;;  %v1188_v48 = vmul.f32 %v2666_v16, %v1117_v42  ;;  %v1086_v49 = vmax.f32 %v839_v45, 0.0  ;;  %v1118_v50 = vmax.f32 %v967_v46, 0.0  ;;  %v841_v51 = vpop.f32.mrb[7].mxu0  ;;  %v969_v52 = vpop.f32.mrb[7].mxu1 }
 0x117   : > { %v1157_v53 = vmul.f32 %v2666_v16, %v1086_v49  ;;  %v1189_v54 = vmul.f32 %v2666_v16, %v1118_v50  ;;  %v1227_v55 = vadd.f32 %v2674_v30, %v1156_v47  ;;  %v1259_v56 = vadd.f32 %v2674_v30, %v1188_v48 }
 0x119   : > { %v1228_v57 = vadd.f32 %v2674_v30, %v1157_v53  ;;  %v1260_v58 = vadd.f32 %v2674_v30, %v1189_v54 }
 0x11a   : > { %v844_v59 = vpop.f32.mrb[8].mxu0  ;;  %v972_v60 = vpop.f32.mrb[8].mxu1 }
 0x11b   : > { %v1998_v61 = vpack.c.bf16 %v1228_v57, %v1227_v55  ;;  %v2078_v62 = vpack.c.bf16 %v1260_v58, %v1259_v56  ;;  %v1087_v63 = vmax.f32 %v844_v59, 0.0  ;;  %v1119_v0 = vmax.f32 %v972_v60, 0.0  ;;  %v846_v1 = vpop.f32.mrb[9].mxu0  ;;  %v974_v2 = vpop.f32.mrb[9].mxu1 }
 0x11c   : > { %v847_v3 = vpop.f32.mrb[10].mxu0  ;;  %v975_v4 = vpop.f32.mrb[10].mxu1 }
 0x11d   : > { %2150 = vst [vmem:[%s2684_s26 + $0x8] sm:$0xff] %v1998_v61   ;;  %2166 = vst [vmem:[%s2684_s26 + $0x88] sm:$0xff] %v2078_v62   ;;  %v1158_v5 = vmul.f32 %v2666_v16, %v1087_v63  ;;  %v1190_v6 = vmul.f32 %v2666_v16, %v1119_v0  ;;  %v1088_v7 = vmax.f32 %v847_v3, 0.0  ;;  %v1120_v8 = vmax.f32 %v975_v4, 0.0  ;;  %v849_v9 = vpop.f32.mrb[11].mxu0  ;;  %v977_v10 = vpop.f32.mrb[11].mxu1 }
 0x11f   : > { %v1159_v11 = vmul.f32 %v2666_v16, %v1088_v7  ;;  %v1191_v12 = vmul.f32 %v2666_v16, %v1120_v8  ;;  %v1229_v13 = vadd.f32 %v2674_v30, %v1158_v5  ;;  %v1261_v14 = vadd.f32 %v2674_v30, %v1190_v6 }
 0x121   : > { %v1230_v15 = vadd.f32 %v2674_v30, %v1159_v11  ;;  %v1262_v17 = vadd.f32 %v2674_v30, %v1191_v12 }
 0x122   : > { %v852_v18 = vpop.f32.mrb[12].mxu0  ;;  %v980_v19 = vpop.f32.mrb[12].mxu1 }
 0x123   : > { %v2003_v20 = vpack.c.bf16 %v1230_v15, %v1229_v13  ;;  %v2083_v21 = vpack.c.bf16 %v1262_v17, %v1261_v14  ;;  %v1089_v22 = vmax.f32 %v852_v18, 0.0  ;;  %v1121_v23 = vmax.f32 %v980_v19, 0.0  ;;  %v854_v24 = vpop.f32.mrb[13].mxu0  ;;  %v982_v25 = vpop.f32.mrb[13].mxu1 }
 0x124   : > { %v855_v26 = vpop.f32.mrb[14].mxu0  ;;  %v983_v27 = vpop.f32.mrb[14].mxu1 }
 0x125   : > { %2151 = vst [vmem:[%s2684_s26 + $0x10] sm:$0xff] %v2003_v20   ;;  %2167 = vst [vmem:[%s2684_s26 + $0x90] sm:$0xff] %v2083_v21   ;;  %v1160_v28 = vmul.f32 %v2666_v16, %v1089_v22  ;;  %v1192_v29 = vmul.f32 %v2666_v16, %v1121_v23  ;;  %v1090_v31 = vmax.f32 %v855_v26, 0.0  ;;  %v1122_v32 = vmax.f32 %v983_v27, 0.0  ;;  %v857_v33 = vpop.f32.mrb[15].mxu0  ;;  %v985_v34 = vpop.f32.mrb[15].mxu1 }
 0x127   : > { %v1161_v35 = vmul.f32 %v2666_v16, %v1090_v31  ;;  %v1193_v36 = vmul.f32 %v2666_v16, %v1122_v32  ;;  %v1231_v37 = vadd.f32 %v2674_v30, %v1160_v28  ;;  %v1263_v38 = vadd.f32 %v2674_v30, %v1192_v29 }
 0x129   : > { %v1232_v39 = vadd.f32 %v2674_v30, %v1161_v35  ;;  %v1264_v40 = vadd.f32 %v2674_v30, %v1193_v36 }
 0x12a   : > { %v860_v41 = vpop.f32.mrb[16].mxu0  ;;  %v988_v42 = vpop.f32.mrb[16].mxu1 }
 0x12b   : > { %v2008_v43 = vpack.c.bf16 %v1232_v39, %v1231_v37  ;;  %v2088_v44 = vpack.c.bf16 %v1264_v40, %v1263_v38  ;;  %v1091_v45 = vmax.f32 %v860_v41, 0.0  ;;  %v1123_v46 = vmax.f32 %v988_v42, 0.0  ;;  %v862_v47 = vpop.f32.mrb[17].mxu0  ;;  %v990_v48 = vpop.f32.mrb[17].mxu1 }
 0x12c   : > { %v863_v49 = vpop.f32.mrb[18].mxu0  ;;  %v991_v50 = vpop.f32.mrb[18].mxu1 }
 0x12d   : > { %2152 = vst [vmem:[%s2684_s26 + $0x18] sm:$0xff] %v2008_v43   ;;  %2168 = vst [vmem:[%s2684_s26 + $0x98] sm:$0xff] %v2088_v44   ;;  %v1162_v51 = vmul.f32 %v2666_v16, %v1091_v45  ;;  %v1194_v52 = vmul.f32 %v2666_v16, %v1123_v46  ;;  %v1092_v53 = vmax.f32 %v863_v49, 0.0  ;;  %v1124_v54 = vmax.f32 %v991_v50, 0.0  ;;  %v865_v55 = vpop.f32.mrb[19].mxu0  ;;  %v993_v56 = vpop.f32.mrb[19].mxu1 }
 0x12f   : > { %v1163_v57 = vmul.f32 %v2666_v16, %v1092_v53  ;;  %v1195_v58 = vmul.f32 %v2666_v16, %v1124_v54  ;;  %v1233_v59 = vadd.f32 %v2674_v30, %v1162_v51  ;;  %v1265_v60 = vadd.f32 %v2674_v30, %v1194_v52 }
 0x131   : > { %v1234_v61 = vadd.f32 %v2674_v30, %v1163_v57  ;;  %v1266_v62 = vadd.f32 %v2674_v30, %v1195_v58 }
 0x132   : > { %v868_v63 = vpop.f32.mrb[20].mxu0  ;;  %v996_v0 = vpop.f32.mrb[20].mxu1 }
 0x133   : > { %v2013_v1 = vpack.c.bf16 %v1234_v61, %v1233_v59  ;;  %v2093_v2 = vpack.c.bf16 %v1266_v62, %v1265_v60  ;;  %v1093_v3 = vmax.f32 %v868_v63, 0.0  ;;  %v1125_v4 = vmax.f32 %v996_v0, 0.0  ;;  %v870_v5 = vpop.f32.mrb[21].mxu0  ;;  %v998_v6 = vpop.f32.mrb[21].mxu1 }
 0x134   : > { %v871_v7 = vpop.f32.mrb[22].mxu0  ;;  %v999_v8 = vpop.f32.mrb[22].mxu1 }
 0x135   : > { %2153 = vst [vmem:[%s2684_s26 + $0x20] sm:$0xff] %v2013_v1   ;;  %2169 = vst [vmem:[%s2684_s26 + $0xa0] sm:$0xff] %v2093_v2   ;;  %v1164_v9 = vmul.f32 %v2666_v16, %v1093_v3  ;;  %v1196_v10 = vmul.f32 %v2666_v16, %v1125_v4  ;;  %v1094_v11 = vmax.f32 %v871_v7, 0.0  ;;  %v1126_v12 = vmax.f32 %v999_v8, 0.0  ;;  %v873_v13 = vpop.f32.mrb[23].mxu0  ;;  %v1001_v14 = vpop.f32.mrb[23].mxu1 }
 0x137   : > { %v1165_v15 = vmul.f32 %v2666_v16, %v1094_v11  ;;  %v1197_v17 = vmul.f32 %v2666_v16, %v1126_v12  ;;  %v1235_v18 = vadd.f32 %v2674_v30, %v1164_v9  ;;  %v1267_v19 = vadd.f32 %v2674_v30, %v1196_v10 }
 0x139   : > { %v1236_v20 = vadd.f32 %v2674_v30, %v1165_v15  ;;  %v1268_v21 = vadd.f32 %v2674_v30, %v1197_v17 }
 0x13a   : > { %v876_v22 = vpop.f32.mrb[24].mxu0  ;;  %v1004_v23 = vpop.f32.mrb[24].mxu1 }
 0x13b   : > { %v2018_v24 = vpack.c.bf16 %v1236_v20, %v1235_v18  ;;  %v2098_v25 = vpack.c.bf16 %v1268_v21, %v1267_v19  ;;  %v1095_v26 = vmax.f32 %v876_v22, 0.0  ;;  %v1127_v27 = vmax.f32 %v1004_v23, 0.0  ;;  %v878_v28 = vpop.f32.mrb[25].mxu0  ;;  %v1006_v29 = vpop.f32.mrb[25].mxu1 }
 0x13c   : > { %v879_v31 = vpop.f32.mrb[26].mxu0  ;;  %v1007_v32 = vpop.f32.mrb[26].mxu1 }
 0x13d   : > { %2154 = vst [vmem:[%s2684_s26 + $0x28] sm:$0xff] %v2018_v24   ;;  %2170 = vst [vmem:[%s2684_s26 + $0xa8] sm:$0xff] %v2098_v25   ;;  %v1166_v33 = vmul.f32 %v2666_v16, %v1095_v26  ;;  %v1198_v34 = vmul.f32 %v2666_v16, %v1127_v27  ;;  %v1096_v35 = vmax.f32 %v879_v31, 0.0  ;;  %v1128_v36 = vmax.f32 %v1007_v32, 0.0  ;;  %v881_v37 = vpop.f32.mrb[27].mxu0  ;;  %v1009_v38 = vpop.f32.mrb[27].mxu1 }
 0x13f   : > { %v1167_v39 = vmul.f32 %v2666_v16, %v1096_v35  ;;  %v1199_v40 = vmul.f32 %v2666_v16, %v1128_v36  ;;  %v1237_v41 = vadd.f32 %v2674_v30, %v1166_v33  ;;  %v1269_v42 = vadd.f32 %v2674_v30, %v1198_v34 }
 0x141   : > { %v1238_v43 = vadd.f32 %v2674_v30, %v1167_v39  ;;  %v1270_v44 = vadd.f32 %v2674_v30, %v1199_v40 }
 0x142   : > { %v884_v45 = vpop.f32.mrb[28].mxu0  ;;  %v1012_v46 = vpop.f32.mrb[28].mxu1 }
 0x143   : > { %v2023_v47 = vpack.c.bf16 %v1238_v43, %v1237_v41  ;;  %v2103_v48 = vpack.c.bf16 %v1270_v44, %v1269_v42  ;;  %v1097_v49 = vmax.f32 %v884_v45, 0.0  ;;  %v1129_v50 = vmax.f32 %v1012_v46, 0.0  ;;  %v886_v51 = vpop.f32.mrb[29].mxu0  ;;  %v1014_v52 = vpop.f32.mrb[29].mxu1 }
 0x144   : > { %v887_v53 = vpop.f32.mrb[30].mxu0  ;;  %v1015_v54 = vpop.f32.mrb[30].mxu1 }
 0x145   : > { %2155 = vst [vmem:[%s2684_s26 + $0x30] sm:$0xff] %v2023_v47   ;;  %2171 = vst [vmem:[%s2684_s26 + $0xb0] sm:$0xff] %v2103_v48   ;;  %v1168_v55 = vmul.f32 %v2666_v16, %v1097_v49  ;;  %v1200_v56 = vmul.f32 %v2666_v16, %v1129_v50  ;;  %v1098_v57 = vmax.f32 %v887_v53, 0.0  ;;  %v1130_v58 = vmax.f32 %v1015_v54, 0.0  ;;  %v889_v59 = vpop.f32.mrb[31].mxu0  ;;  %v1017_v60 = vpop.f32.mrb[31].mxu1 }
 0x147   : > { %v1169_v61 = vmul.f32 %v2666_v16, %v1098_v57  ;;  %v1201_v62 = vmul.f32 %v2666_v16, %v1130_v58  ;;  %v1239_v63 = vadd.f32 %v2674_v30, %v1168_v55  ;;  %v1271_v0 = vadd.f32 %v2674_v30, %v1200_v56 }
 0x149   : > { %v1240_v1 = vadd.f32 %v2674_v30, %v1169_v61  ;;  %v1272_v2 = vadd.f32 %v2674_v30, %v1201_v62 }
 0x14a   : > { %v892_v3 = vpop.f32.mrb[32].mxu0  ;;  %v1020_v4 = vpop.f32.mrb[32].mxu1 }
 0x14b   : > { %v2028_v5 = vpack.c.bf16 %v1240_v1, %v1239_v63  ;;  %v2108_v6 = vpack.c.bf16 %v1272_v2, %v1271_v0  ;;  %v1099_v7 = vmax.f32 %v892_v3, 0.0  ;;  %v1131_v8 = vmax.f32 %v1020_v4, 0.0  ;;  %v894_v9 = vpop.f32.mrb[33].mxu0  ;;  %v1022_v10 = vpop.f32.mrb[33].mxu1 }
 0x14c   : > { %v895_v11 = vpop.f32.mrb[34].mxu0  ;;  %v1023_v12 = vpop.f32.mrb[34].mxu1 }
 0x14d   : > { %2156 = vst [vmem:[%s2684_s26 + $0x38] sm:$0xff] %v2028_v5   ;;  %2172 = vst [vmem:[%s2684_s26 + $0xb8] sm:$0xff] %v2108_v6   ;;  %v1170_v13 = vmul.f32 %v2666_v16, %v1099_v7  ;;  %v1202_v14 = vmul.f32 %v2666_v16, %v1131_v8  ;;  %v1100_v15 = vmax.f32 %v895_v11, 0.0  ;;  %v1132_v17 = vmax.f32 %v1023_v12, 0.0  ;;  %v897_v18 = vpop.f32.mrb[35].mxu0  ;;  %v1025_v19 = vpop.f32.mrb[35].mxu1 }
 0x14f   : > { %v1171_v20 = vmul.f32 %v2666_v16, %v1100_v15  ;;  %v1203_v21 = vmul.f32 %v2666_v16, %v1132_v17  ;;  %v1241_v22 = vadd.f32 %v2674_v30, %v1170_v13  ;;  %v1273_v23 = vadd.f32 %v2674_v30, %v1202_v14 }
 0x151   : > { %v1242_v24 = vadd.f32 %v2674_v30, %v1171_v20  ;;  %v1274_v25 = vadd.f32 %v2674_v30, %v1203_v21 }
 0x152   : > { %v900_v26 = vpop.f32.mrb[36].mxu0  ;;  %v1028_v27 = vpop.f32.mrb[36].mxu1 }
 0x153   : > { %v2033_v28 = vpack.c.bf16 %v1242_v24, %v1241_v22  ;;  %v2113_v29 = vpack.c.bf16 %v1274_v25, %v1273_v23  ;;  %v1101_v31 = vmax.f32 %v900_v26, 0.0  ;;  %v1133_v32 = vmax.f32 %v1028_v27, 0.0  ;;  %v902_v33 = vpop.f32.mrb[37].mxu0  ;;  %v1030_v34 = vpop.f32.mrb[37].mxu1 }
 0x154   : > { %v903_v35 = vpop.f32.mrb[38].mxu0  ;;  %v1031_v36 = vpop.f32.mrb[38].mxu1 }
 0x155   : > { %2157 = vst [vmem:[%s2684_s26 + $0x40] sm:$0xff] %v2033_v28   ;;  %2173 = vst [vmem:[%s2684_s26 + $0xc0] sm:$0xff] %v2113_v29   ;;  %v1172_v37 = vmul.f32 %v2666_v16, %v1101_v31  ;;  %v1204_v38 = vmul.f32 %v2666_v16, %v1133_v32  ;;  %v1102_v39 = vmax.f32 %v903_v35, 0.0  ;;  %v1134_v40 = vmax.f32 %v1031_v36, 0.0  ;;  %v905_v41 = vpop.f32.mrb[39].mxu0  ;;  %v1033_v42 = vpop.f32.mrb[39].mxu1 }
 0x157   : > { %v1173_v43 = vmul.f32 %v2666_v16, %v1102_v39  ;;  %v1205_v44 = vmul.f32 %v2666_v16, %v1134_v40  ;;  %v1243_v45 = vadd.f32 %v2674_v30, %v1172_v37  ;;  %v1275_v46 = vadd.f32 %v2674_v30, %v1204_v38 }
 0x159   : > { %v1244_v47 = vadd.f32 %v2674_v30, %v1173_v43  ;;  %v1276_v48 = vadd.f32 %v2674_v30, %v1205_v44 }
 0x15a   : > { %v908_v49 = vpop.f32.mrb[40].mxu0  ;;  %v1036_v50 = vpop.f32.mrb[40].mxu1 }
 0x15b   : > { %v2038_v51 = vpack.c.bf16 %v1244_v47, %v1243_v45  ;;  %v2118_v52 = vpack.c.bf16 %v1276_v48, %v1275_v46  ;;  %v1103_v53 = vmax.f32 %v908_v49, 0.0  ;;  %v1135_v54 = vmax.f32 %v1036_v50, 0.0  ;;  %v910_v55 = vpop.f32.mrb[41].mxu0  ;;  %v1038_v56 = vpop.f32.mrb[41].mxu1 }
 0x15c   : > { %v911_v57 = vpop.f32.mrb[42].mxu0  ;;  %v1039_v58 = vpop.f32.mrb[42].mxu1 }
 0x15d   : > { %2158 = vst [vmem:[%s2684_s26 + $0x48] sm:$0xff] %v2038_v51   ;;  %2174 = vst [vmem:[%s2684_s26 + $0xc8] sm:$0xff] %v2118_v52   ;;  %v1174_v59 = vmul.f32 %v2666_v16, %v1103_v53  ;;  %v1206_v60 = vmul.f32 %v2666_v16, %v1135_v54  ;;  %v1104_v61 = vmax.f32 %v911_v57, 0.0  ;;  %v1136_v62 = vmax.f32 %v1039_v58, 0.0  ;;  %v913_v63 = vpop.f32.mrb[43].mxu0  ;;  %v1041_v0 = vpop.f32.mrb[43].mxu1 }
 0x15f   : > { %v1175_v1 = vmul.f32 %v2666_v16, %v1104_v61  ;;  %v1207_v2 = vmul.f32 %v2666_v16, %v1136_v62  ;;  %v1245_v3 = vadd.f32 %v2674_v30, %v1174_v59  ;;  %v1277_v4 = vadd.f32 %v2674_v30, %v1206_v60 }
 0x161   : > { %v1246_v5 = vadd.f32 %v2674_v30, %v1175_v1  ;;  %v1278_v6 = vadd.f32 %v2674_v30, %v1207_v2 }
 0x162   : > { %v916_v7 = vpop.f32.mrb[44].mxu0  ;;  %v1044_v8 = vpop.f32.mrb[44].mxu1 }
 0x163   : > { %v2043_v9 = vpack.c.bf16 %v1246_v5, %v1245_v3  ;;  %v2123_v10 = vpack.c.bf16 %v1278_v6, %v1277_v4  ;;  %v1105_v11 = vmax.f32 %v916_v7, 0.0  ;;  %v1137_v12 = vmax.f32 %v1044_v8, 0.0  ;;  %v918_v13 = vpop.f32.mrb[45].mxu0  ;;  %v1046_v14 = vpop.f32.mrb[45].mxu1 }
 0x164   : > { %v919_v15 = vpop.f32.mrb[46].mxu0  ;;  %v1047_v17 = vpop.f32.mrb[46].mxu1 }
 0x165   : > { %2159 = vst [vmem:[%s2684_s26 + $0x50] sm:$0xff] %v2043_v9   ;;  %2175 = vst [vmem:[%s2684_s26 + $0xd0] sm:$0xff] %v2123_v10   ;;  %v1176_v18 = vmul.f32 %v2666_v16, %v1105_v11  ;;  %v1208_v19 = vmul.f32 %v2666_v16, %v1137_v12  ;;  %v1106_v20 = vmax.f32 %v919_v15, 0.0  ;;  %v1138_v21 = vmax.f32 %v1047_v17, 0.0  ;;  %v921_v22 = vpop.f32.mrb[47].mxu0  ;;  %v1049_v23 = vpop.f32.mrb[47].mxu1 }
 0x167   : > { %v1177_v24 = vmul.f32 %v2666_v16, %v1106_v20  ;;  %v1209_v25 = vmul.f32 %v2666_v16, %v1138_v21  ;;  %v1247_v26 = vadd.f32 %v2674_v30, %v1176_v18  ;;  %v1279_v27 = vadd.f32 %v2674_v30, %v1208_v19 }
 0x169   : > { %v1248_v28 = vadd.f32 %v2674_v30, %v1177_v24  ;;  %v1280_v29 = vadd.f32 %v2674_v30, %v1209_v25 }
 0x16a   : > { %v924_v31 = vpop.f32.mrb[48].mxu0  ;;  %v1052_v32 = vpop.f32.mrb[48].mxu1 }
 0x16b   : > { %v2048_v33 = vpack.c.bf16 %v1248_v28, %v1247_v26  ;;  %v2128_v34 = vpack.c.bf16 %v1280_v29, %v1279_v27  ;;  %v1107_v35 = vmax.f32 %v924_v31, 0.0  ;;  %v1139_v36 = vmax.f32 %v1052_v32, 0.0  ;;  %v926_v37 = vpop.f32.mrb[49].mxu0  ;;  %v1054_v38 = vpop.f32.mrb[49].mxu1 }
 0x16c   : > { %v927_v39 = vpop.f32.mrb[50].mxu0  ;;  %v1055_v40 = vpop.f32.mrb[50].mxu1 }
 0x16d   : > { %2160 = vst [vmem:[%s2684_s26 + $0x58] sm:$0xff] %v2048_v33   ;;  %2176 = vst [vmem:[%s2684_s26 + $0xd8] sm:$0xff] %v2128_v34   ;;  %v1178_v41 = vmul.f32 %v2666_v16, %v1107_v35  ;;  %v1210_v42 = vmul.f32 %v2666_v16, %v1139_v36  ;;  %v1108_v43 = vmax.f32 %v927_v39, 0.0  ;;  %v1140_v44 = vmax.f32 %v1055_v40, 0.0  ;;  %v929_v45 = vpop.f32.mrb[51].mxu0  ;;  %v1057_v46 = vpop.f32.mrb[51].mxu1 }
 0x16f   : > { %v1179_v47 = vmul.f32 %v2666_v16, %v1108_v43  ;;  %v1211_v48 = vmul.f32 %v2666_v16, %v1140_v44  ;;  %v1249_v49 = vadd.f32 %v2674_v30, %v1178_v41  ;;  %v1281_v50 = vadd.f32 %v2674_v30, %v1210_v42 }
 0x171   : > { %v1250_v51 = vadd.f32 %v2674_v30, %v1179_v47  ;;  %v1282_v52 = vadd.f32 %v2674_v30, %v1211_v48 }
 0x172   : > { %v932_v53 = vpop.f32.mrb[52].mxu0  ;;  %v1060_v54 = vpop.f32.mrb[52].mxu1 }
 0x173   : > { %v2053_v55 = vpack.c.bf16 %v1250_v51, %v1249_v49  ;;  %v2133_v56 = vpack.c.bf16 %v1282_v52, %v1281_v50  ;;  %v1109_v57 = vmax.f32 %v932_v53, 0.0  ;;  %v1141_v58 = vmax.f32 %v1060_v54, 0.0  ;;  %v934_v59 = vpop.f32.mrb[53].mxu0  ;;  %v1062_v60 = vpop.f32.mrb[53].mxu1 }
 0x174   : > { %v935_v61 = vpop.f32.mrb[54].mxu0  ;;  %v1063_v62 = vpop.f32.mrb[54].mxu1 }
 0x175   : > { %2161 = vst [vmem:[%s2684_s26 + $0x60] sm:$0xff] %v2053_v55   ;;  %2177 = vst [vmem:[%s2684_s26 + $0xe0] sm:$0xff] %v2133_v56   ;;  %v1180_v63 = vmul.f32 %v2666_v16, %v1109_v57  ;;  %v1212_v0 = vmul.f32 %v2666_v16, %v1141_v58  ;;  %v1110_v1 = vmax.f32 %v935_v61, 0.0  ;;  %v1142_v2 = vmax.f32 %v1063_v62, 0.0  ;;  %v937_v3 = vpop.f32.mrb[55].mxu0  ;;  %v1065_v4 = vpop.f32.mrb[55].mxu1 }
 0x177   : > { %v1181_v5 = vmul.f32 %v2666_v16, %v1110_v1  ;;  %v1213_v6 = vmul.f32 %v2666_v16, %v1142_v2  ;;  %v1251_v7 = vadd.f32 %v2674_v30, %v1180_v63  ;;  %v1283_v8 = vadd.f32 %v2674_v30, %v1212_v0 }
 0x179   : > { %v1252_v9 = vadd.f32 %v2674_v30, %v1181_v5  ;;  %v1284_v10 = vadd.f32 %v2674_v30, %v1213_v6 }
 0x17a   : > { %v940_v11 = vpop.f32.mrb[56].mxu0  ;;  %v1068_v12 = vpop.f32.mrb[56].mxu1 }
 0x17b   : > { %v2058_v13 = vpack.c.bf16 %v1252_v9, %v1251_v7  ;;  %v2138_v14 = vpack.c.bf16 %v1284_v10, %v1283_v8  ;;  %v1111_v15 = vmax.f32 %v940_v11, 0.0  ;;  %v1143_v17 = vmax.f32 %v1068_v12, 0.0  ;;  %v942_v18 = vpop.f32.mrb[57].mxu0  ;;  %v1070_v19 = vpop.f32.mrb[57].mxu1 }
 0x17c   : > { %v943_v20 = vpop.f32.mrb[58].mxu0  ;;  %v1071_v21 = vpop.f32.mrb[58].mxu1 }
 0x17d   : > { %2162 = vst [vmem:[%s2684_s26 + $0x68] sm:$0xff] %v2058_v13   ;;  %2178 = vst [vmem:[%s2684_s26 + $0xe8] sm:$0xff] %v2138_v14   ;;  %v1182_v22 = vmul.f32 %v2666_v16, %v1111_v15  ;;  %v1214_v23 = vmul.f32 %v2666_v16, %v1143_v17  ;;  %v1112_v24 = vmax.f32 %v943_v20, 0.0  ;;  %v1144_v25 = vmax.f32 %v1071_v21, 0.0  ;;  %v945_v26 = vpop.f32.mrb[59].mxu0  ;;  %v1073_v27 = vpop.f32.mrb[59].mxu1 }
 0x17f   : > { %v1183_v28 = vmul.f32 %v2666_v16, %v1112_v24  ;;  %v1215_v29 = vmul.f32 %v2666_v16, %v1144_v25  ;;  %v1253_v31 = vadd.f32 %v2674_v30, %v1182_v22  ;;  %v1285_v32 = vadd.f32 %v2674_v30, %v1214_v23 }
 0x181   : > { %v1254_v33 = vadd.f32 %v2674_v30, %v1183_v28  ;;  %v1286_v34 = vadd.f32 %v2674_v30, %v1215_v29 }
 0x182   : > { %v948_v35 = vpop.f32.mrb[60].mxu0  ;;  %v1076_v36 = vpop.f32.mrb[60].mxu1 }
 0x183   : > { %v2063_v37 = vpack.c.bf16 %v1254_v33, %v1253_v31  ;;  %v2143_v38 = vpack.c.bf16 %v1286_v34, %v1285_v32  ;;  %v1113_v39 = vmax.f32 %v948_v35, 0.0  ;;  %v1145_v40 = vmax.f32 %v1076_v36, 0.0  ;;  %v950_v41 = vpop.f32.mrb[61].mxu0  ;;  %v1078_v42 = vpop.f32.mrb[61].mxu1 }
 0x184   : > { %v951_v43 = vpop.f32.mrb[62].mxu0  ;;  %v1079_v44 = vpop.f32.mrb[62].mxu1 }
 0x185   : > { %2163 = vst [vmem:[%s2684_s26 + $0x70] sm:$0xff] %v2063_v37   ;;  %2179 = vst [vmem:[%s2684_s26 + $0xf0] sm:$0xff] %v2143_v38   ;;  %v1184_v45 = vmul.f32 %v2666_v16, %v1113_v39  ;;  %v1216_v46 = vmul.f32 %v2666_v16, %v1145_v40  ;;  %v1114_v47 = vmax.f32 %v951_v43, 0.0  ;;  %v1146_v48 = vmax.f32 %v1079_v44, 0.0  ;;  %v953_v49 = vpop.f32.mrb[63].mxu0  ;;  %v1081_v50 = vpop.f32.mrb[63].mxu1 }
 0x187   : > { %v1185_v51 = vmul.f32 %v2666_v16, %v1114_v47  ;;  %v1217_v52 = vmul.f32 %v2666_v16, %v1146_v48  ;;  %v1255_v53 = vadd.f32 %v2674_v30, %v1184_v45  ;;  %v1287_v54 = vadd.f32 %v2674_v30, %v1216_v46 }
 0x189   : > { %v1256_v55 = vadd.f32 %v2674_v30, %v1185_v51  ;;  %v1288_v56 = vadd.f32 %v2674_v30, %v1217_v52 }
 0x18b   : > { %v2068_v16 = vpack.c.bf16 %v1256_v55, %v1255_v53  ;;  %v2148_v57 = vpack.c.bf16 %v1288_v56, %v1287_v54 }
 0x18d   : > { %2164 = vst [vmem:[%s2684_s26 + $0x78] sm:$0xff] %v2068_v16   ;;  %2180 = vst [vmem:[%s2684_s26 + $0xf8] sm:$0xff] %v2148_v57  }
 0x18e   : > { %2379 = shalt.err (!%p2376_p5)
}
 0x18f   : > { %s2380_s12 = scalar_lea.hbm %s2841_s7, 4096  ;;  %s2384_s21 = scalar_lea.hbm %s2899_s4, 16384 }
 0x190   : > { %p2381_p6 = scmp.ne.s32.totalorder %s2841_s7, %s2380_s12  ;;  %p2385_p10 = scmp.lt.u32.totalorder %s2841_s7, %s2899_s4 }
 0x191   : > { %p2386_p11 = scmp.lt.u32.totalorder %s2384_s21, %s2380_s12  ;;  %p2388_p13 = scmp.lt.u32.totalorder %s2380_s12, %s2841_s7 }
 0x192   : > { %p2382_p7 = pnand %p2381_p6, %p2516_p4 }
 0x193   : > { %p2387_p12 = por %p2386_p11, %p2385_p10 }
 0x194   : > { %p2383_p9 = pneg %p2382_p7 }
 0x195   : > { %p2389_p0 = por %p2388_p13, %p2387_p12 }
 0x197   : > { %p2390_p1 = pnand %p2389_p0, %p2383_p9 }
 0x199   : > { %2393 = shalt.err (!%p2390_p1)
}
 0x19a   : > { %s2449_s26 = smov 64   ;;  %s2450_s29 = smov 4  }
 0x19b   : > { %2201 = dma.vmem_to_hbm [thread:$0]  (%p2516_p4), %s2843_s30, 4096, %s2841_s7, %s2849_s18, %s2449_s26, %s2449_s26, %s2450_s29  }
 0x19c PF: > { %p2207_p2 = scmp.ge.s32.totalorder %s2444_s20, 2  ;;  %s1639_s5 = sand.u32 1, %s2424_s15  }
 0x19d   : > { %s1640_s6 = scalar_lea.sflag [#allocation3], %s1639_s5 }
 0x19e   : > { %p2204_p3 = pnand %p2207_p2, %p2523_p8 }
 0x1a0   : > { %2419 = dma.done.wait (!%p2204_p3), %s1640_s6, 4096  }
 0x1a1   : > { %2421 = vsyncadd (!%p2204_p3), %s1640_s6, 4294963200  ;;  %s17_s20 = sadd.s32 1, %s2444_s20   ;;  %s2902_s15 = smov %s2428_s16 }
 0x1a2   : > { %p14_p5 = scmp.ge.s32.totalorder %s17_s20, 6   ;;  %s2903_s16 = smov %s2432_s17 }
 0x1a3   : > { %s2904_s17 = smov %s2529_s28  ;;  %s2905_s18 = smov %s2440_s19 }
 0x1a4   : > { %s2906_s19 = smov %s2908_s23  ;;  %16 = sbr.rel (!%p14_p5) target bundleno = 4 (0x4), region = 80 }
 0x1ab   :  { %1645 = vsyncpa [#allocation3], 1 }
 0x1ac   :  { %1647 = vsyncpa [#allocation3 + $0x1], 1 }

</bundles_post_ra>
